<compile_context>
chip_gen: v7x
topology: tpu7x:2x2x1
jax: 0.10.0
libtpu: 0.0.40
codegen_flags: <defaults>
</compile_context>

<pallas_src>
import functools

import jax
import jax.numpy as jnp
from jax import lax
from jax.experimental import pallas as pl
from jax.experimental.pallas import tpu as pltpu


def _round_up(x, m):
    return (x + m - 1) // m * m


def _cdiv(a, b):
    return -(-a // b)


# ----------------------------------------------------------------------------
# Fused kernel body.  Grid = (batch_tiles, num_layers); layer axis is last.
# ----------------------------------------------------------------------------
def _fused_rnn_kernel(num_layers, seq_len, tb, chunk_t,
                      x_ref, wt_ref, bt_ref,
                      w_ih_ref, w_hh_ref, b_ref,
                      wp1_ref, bp1_ref, wp2_ref, bp2_ref,
                      o_ref, seq_ref):
    l = pl.program_id(1)
    T = seq_len
    Hp = seq_ref.shape[1]
    Dp = x_ref.shape[2]

    # ---- layer 0 only: trans = Linear(input, hidden) over ALL timesteps -----
    @pl.when(l == 0)
    def _():
        wt_bf = wt_ref[...].astype(jnp.bfloat16)
        bt = bt_ref[...]
        for t0 in range(0, T, chunk_t):
            ct = min(chunk_t, T - t0)
            xc = x_ref[t0:t0 + ct].reshape(ct * tb, Dp).astype(jnp.bfloat16)
            seq_ref[t0 * tb:(t0 + ct) * tb, :] = (
                jnp.dot(xc, wt_bf, preferred_element_type=jnp.float32) + bt)

    # ---- hoisted input projection for THIS layer (in place, chunked) --------
    # Rows are independent, so per-chunk read -> matmul -> same-row write is
    # safe and needs no second full-sequence buffer.
    w_ih_bf = w_ih_ref[...].astype(jnp.bfloat16)
    bias = b_ref[...]
    for t0 in range(0, T, chunk_t):
        ct = min(chunk_t, T - t0)
        r0, nr = t0 * tb, ct * tb
        sc = seq_ref[r0:r0 + nr, :].astype(jnp.bfloat16)
        seq_ref[r0:r0 + nr, :] = (
            jnp.dot(sc, w_ih_bf, preferred_element_type=jnp.float32) + bias)

    # ---- serial recurrence: h_t = tanh(pre_t + h_{t-1} @ W_hh), f32 ---------
    w_hh = w_hh_ref[...]

    def step(t, h):
        idx = pl.multiple_of(t * tb, tb)
        pre_t = seq_ref[pl.ds(idx, tb), :]
        h_new = jnp.tanh(
            pre_t + jnp.dot(h, w_hh, preferred_element_type=jnp.float32))
        # Overwrite this layer's output sequence in place.
        seq_ref[pl.ds(idx, tb), :] = h_new
        return h_new

    h0 = jnp.zeros((tb, Hp), jnp.float32)
    h_last = lax.fori_loop(0, T, step, h0, unroll=min(T, 8))

    # ---- last layer only: predictor MLP on last timestep --------------------
    @pl.when(l == num_layers - 1)
    def _():
        hdd = jnp.maximum(
            jnp.dot(h_last.astype(jnp.bfloat16),
                    wp1_ref[...].astype(jnp.bfloat16),
                    preferred_element_type=jnp.float32) + bp1_ref[...],
            0.0)
        o_ref[...] = (
            jnp.dot(hdd.astype(jnp.bfloat16),
                    wp2_ref[...].astype(jnp.bfloat16),
                    preferred_element_type=jnp.float32) + bp2_ref[...]
        ).astype(o_ref.dtype)


# ----------------------------------------------------------------------------
# Wrapper: pad to lane/sublane-dense tiles and launch ONE pallas_call.
# ----------------------------------------------------------------------------
def _pad2d(w, rows, cols):
    w = jnp.asarray(w, jnp.float32)
    return jnp.zeros((rows, cols), jnp.float32).at[:w.shape[0], :w.shape[1]].set(w)


@functools.partial(jax.jit, static_argnames=("num_layers",))
def rnn_forward(x, params, num_layers):
    B, T, D = x.shape
    H = params["w_trans"].shape[1]
    P = params["w_p2"].shape[1]

    # Padding: batch to sublanes, features to lanes.  v6e/v7x MXUs are
    # 256-wide, so hidden > 128 rounds to 256-multiples; <=128 stays at 128.
    Bp = _round_up(max(B, 8), 8)
    Dp = _round_up(max(D, 128), 128)
    Hp = 128 if H <= 128 else _round_up(H, 256)
    Pp = _round_up(max(P, 128), 128)

    # Batch-parallel grid axis: 2 tiles when batch allows (both v7x cores),
    # otherwise a single tile.  The RNN is independent across batch.
    tb = _round_up(_cdiv(Bp, 2), 8) if Bp >= 16 else Bp
    n_bt = _cdiv(Bp, tb)
    Bt = n_bt * tb

    chunk_t = max(1, min(T, 512 // tb))   # timesteps per projection chunk

    x = x.astype(jnp.float32)
    # Time-major, zero-padded input (raw input size, not hidden size).
    x_tm = (jnp.zeros((T, Bt, Dp), jnp.float32)
            .at[:, :B, :D].set(jnp.transpose(x, (1, 0, 2))))

    w_trans = _pad2d(params["w_trans"], Dp, Hp)
    b_trans = _pad2d(params["b_trans"], 1, Hp)
    w_ih_all = jnp.stack(
        [_pad2d(params[f"w_ih_{l}"], Hp, Hp) for l in range(num_layers)])
    w_hh_all = jnp.stack(
        [_pad2d(params[f"w_hh_{l}"], Hp, Hp) for l in range(num_layers)])
    b_all = jnp.stack(
        [_pad2d(params[f"b_{l}"], 1, Hp) for l in range(num_layers)])
    w_p1 = _pad2d(params["w_p1"], Hp, Hp)
    b_p1 = _pad2d(params["b_p1"], 1, Hp)
    w_p2 = _pad2d(params["w_p2"], Hp, Pp)
    b_p2 = _pad2d(params["b_p2"], 1, Pp)

    in_specs = [
        pl.BlockSpec((T, tb, Dp), lambda b, l: (0, b, 0)),       # x (per batch tile)
        pl.BlockSpec((Dp, Hp), lambda b, l: (0, 0)),             # trans W
        pl.BlockSpec((1, Hp), lambda b, l: (0, 0)),              # trans b
        pl.BlockSpec((None, Hp, Hp), lambda b, l: (l, 0, 0)),    # W_ih (streamed)
        pl.BlockSpec((None, Hp, Hp), lambda b, l: (l, 0, 0)),    # W_hh (streamed)
        pl.BlockSpec((None, 1, Hp), lambda b, l: (l, 0, 0)),     # b_ih+b_hh (streamed)
        pl.BlockSpec((Hp, Hp), lambda b, l: (0, 0)),             # predictor W1
        pl.BlockSpec((1, Hp), lambda b, l: (0, 0)),              # predictor b1
        pl.BlockSpec((Hp, Pp), lambda b, l: (0, 0)),             # predictor W2
        pl.BlockSpec((1, Pp), lambda b, l: (0, 0)),              # predictor b2
    ]

    # VMEM budget: scratch + double-buffered blocks + headroom, capped at the
    # v7x 64 MiB physical VMEM.
    f32 = 4
    scratch_bytes = T * tb * Hp * f32
    block_bytes = (T * tb * Dp + Dp * Hp + Hp + 2 * Hp * Hp + Hp
                   + Hp * Hp + Hp + Hp * Pp + Pp + tb * Pp) * f32
    vmem_limit = int(min(max(scratch_bytes + 2 * block_bytes + (8 << 20),
                             32 << 20), 64 << 20))

    flops = (2 * T * Bt * Dp * Hp
             + num_layers * 4 * T * Bt * Hp * Hp
             + 2 * Bt * Hp * Hp + 2 * Bt * Hp * Pp)
    bytes_accessed = int(
        (x_tm.size + w_trans.size + b_trans.size + w_ih_all.size
         + w_hh_all.size + b_all.size + w_p1.size + b_p1.size + w_p2.size
         + b_p2.size + Bt * Pp) * f32)
    transcendentals = num_layers * T * Bt * Hp

    kernel = functools.partial(_fused_rnn_kernel, num_layers, T, tb, chunk_t)
    y_pad = pl.pallas_call(
        kernel,
        out_shape=jax.ShapeDtypeStruct((Bt, Pp), jnp.float32),
        grid=(n_bt, num_layers),
        in_specs=in_specs,
        out_specs=pl.BlockSpec((tb, Pp), lambda b, l: (b, 0)),
        scratch_shapes=[pltpu.VMEM((T * tb, Hp), jnp.float32)],  # seq buffer
        compiler_params=pltpu.CompilerParams(
            dimension_semantics=("parallel", "arbitrary"),
            vmem_limit_bytes=vmem_limit),
        cost_estimate=pl.CostEstimate(
            flops=flops, bytes_accessed=bytes_accessed,
            transcendentals=transcendentals),
    )(x_tm, w_trans, b_trans, w_ih_all, w_hh_all, b_all,
      w_p1, b_p1, w_p2, b_p2)

    return y_pad[:B, :P]


# ----------------------------------------------------------------------------
# Parameter init + pure-JAX f32 reference
# ----------------------------------------------------------------------------
def init_params(key, input_size, hidden_size, num_layers, num_preds):
    def u(key, shape, fan_in):
        bound = 1.0 / jnp.sqrt(jnp.float32(fan_in))
        return jax.random.uniform(key, shape, jnp.float32, -bound, bound)

    keys = jax.random.split(key, 4 + 4 * num_layers + 4)
    p = {}
    p["w_trans"] = u(keys[0], (input_size, hidden_size), input_size)
    p["b_trans"] = u(keys[1], (1, hidden_size), input_size)
    for l in range(num_layers):
        k0, k1, k2, k3 = keys[2 + 4 * l: 6 + 4 * l]
        p[f"w_ih_{l}"] = u(k0, (hidden_size, hidden_size), hidden_size)
        p[f"w_hh_{l}"] = u(k1, (hidden_size, hidden_size), hidden_size)
        p[f"b_{l}"] = u(k2, (1, hidden_size), hidden_size) + u(
            k3, (1, hidden_size), hidden_size)
    ko = keys[2 + 4 * num_layers:]
    p["w_p1"] = u(ko[0], (hidden_size, hidden_size), hidden_size)
    p["b_p1"] = u(ko[1], (1, hidden_size), hidden_size)
    p["w_p2"] = u(ko[2], (hidden_size, num_preds), hidden_size)
    p["b_p2"] = u(ko[3], (1, num_preds), hidden_size)
    return p


def rnn_forward_ref(x, params, num_layers):
    B, T, D = x.shape
    x = x.astype(jnp.float32)
    seq = x @ params["w_trans"] + params["b_trans"]
    for l in range(num_layers):
        w_ih, w_hh, b = params[f"w_ih_{l}"], params[f"w_hh_{l}"], params[f"b_{l}"]
        hs = jnp.zeros((B, w_ih.shape[1]), jnp.float32)
        outs = []
        for t in range(T):
            hs = jnp.tanh(seq[:, t, :] @ w_ih + hs @ w_hh + b)
            outs.append(hs)
        seq = jnp.stack(outs, axis=1)
    last = seq[:, -1, :]
    hdd = jnp.maximum(last @ params["w_p1"] + params["b_p1"], 0.0)
    return hdd @ params["w_p2"] + params["b_p2"]


# ----------------------------------------------------------------------------
if __name__ == "__main__":
    input_size = 16
    hidden_size = 32
    num_layers = 2
    num_preds = 4
    batch = 2
    seq_len = 8

    key = jax.random.PRNGKey(0)
    k_x, k_p = jax.random.split(key)
    x = jax.random.normal(k_x, (batch, seq_len, input_size), jnp.float32)
    params = init_params(k_p, input_size, hidden_size, num_layers, num_preds)

    y = rnn_forward(x, params, num_layers)
    y = jax.block_until_ready(y)

    y_ref = rnn_forward_ref(x, params, num_layers)
    assert y.shape == (batch, num_preds), y.shape
    # Looser tolerance: bf16 MXU operands (f32 accumulation) vs f32 reference.
    assert jnp.allclose(y, y_ref, rtol=3e-2, atol=3e-2), (
        "mismatch vs reference: " + str(jnp.max(jnp.abs(y - y_ref)))
    )
    print("KERNEL_OK")
</pallas_src>

<mosaic_0001>
module attributes {stable_mosaic.version = 11 : i64} {
  func.func @_fused_rnn_kernel(%arg0: i32, %arg1: i32, %arg2: memref<8x8x128xf32, #tpu.memory_space<vmem>>, %arg3: memref<128x128xf32, #tpu.memory_space<vmem>>, %arg4: memref<1x128xf32, #tpu.memory_space<vmem>>, %arg5: memref<1x128x128xf32, #tpu.memory_space<vmem>>, %arg6: memref<1x128x128xf32, #tpu.memory_space<vmem>>, %arg7: memref<1x1x128xf32, #tpu.memory_space<vmem>>, %arg8: memref<128x128xf32, #tpu.memory_space<vmem>>, %arg9: memref<1x128xf32, #tpu.memory_space<vmem>>, %arg10: memref<128x128xf32, #tpu.memory_space<vmem>>, %arg11: memref<1x128xf32, #tpu.memory_space<vmem>>, %arg12: memref<8x128xf32, #tpu.memory_space<vmem>>, %arg13: memref<64x128xf32, #tpu.memory_space<vmem>>) attributes {dimension_semantics = [#tpu.dimension_semantics<parallel>, #tpu.dimension_semantics<arbitrary>], iteration_bounds = array<i64: 1, 2>, scalar_prefetch = 0 : i64, scratch_operands = 1 : i64, tpu.core_type = #tpu.core_type<tc>, window_params = [{transform_indices = @transform_0, window_bounds = array<i64: 8, 8, 128>}, {pipeline_mode = #tpu.pipeline_mode<synchronous>, transform_indices = @transform_1, window_bounds = array<i64: 128, 128>}, {pipeline_mode = #tpu.pipeline_mode<synchronous>, transform_indices = @transform_2, window_bounds = array<i64: 1, 128>}, {transform_indices = @transform_3, window_bounds = array<i64: 1, 128, 128>}, {transform_indices = @transform_4, window_bounds = array<i64: 1, 128, 128>}, {transform_indices = @transform_5, window_bounds = array<i64: 1, 1, 128>}, {pipeline_mode = #tpu.pipeline_mode<synchronous>, transform_indices = @transform_6, window_bounds = array<i64: 128, 128>}, {pipeline_mode = #tpu.pipeline_mode<synchronous>, transform_indices = @transform_7, window_bounds = array<i64: 1, 128>}, {pipeline_mode = #tpu.pipeline_mode<synchronous>, transform_indices = @transform_8, window_bounds = array<i64: 128, 128>}, {pipeline_mode = #tpu.pipeline_mode<synchronous>, transform_indices = @transform_9, window_bounds = array<i64: 1, 128>}, {transform_indices = @transform_10, window_bounds = array<i64: 8, 128>}]} {
    %c0_i32 = arith.constant 0 : i32
    %0 = arith.cmpi eq, %arg1, %c0_i32 : i32
    %1 = arith.extui %0 : i1 to i32
    %c0_i32_0 = arith.constant 0 : i32
    %2 = arith.cmpi ne, %1, %c0_i32_0 : i32
    scf.if %2 {
      %c0_49 = arith.constant 0 : index
      %c0_50 = arith.constant 0 : index
      %92 = vector.load %arg3[%c0_49, %c0_50] : memref<128x128xf32, #tpu.memory_space<vmem>>, vector<128x128xf32>
      %93 = arith.truncf %92 : vector<128x128xf32> to vector<128x128xbf16>
      %c0_51 = arith.constant 0 : index
      %c0_52 = arith.constant 0 : index
      %94 = vector.load %arg4[%c0_51, %c0_52] : memref<1x128xf32, #tpu.memory_space<vmem>>, vector<1x128xf32>
      %c0_53 = arith.constant 0 : index
      %c0_54 = arith.constant 0 : index
      %c0_55 = arith.constant 0 : index
      %95 = vector.load %arg2[%c0_53, %c0_54, %c0_55] : memref<8x8x128xf32, #tpu.memory_space<vmem>>, vector<8x8x128xf32>
      %96 = vector.shape_cast %95 : vector<8x8x128xf32> to vector<64x128xf32>
      %97 = arith.truncf %96 : vector<64x128xf32> to vector<64x128xbf16>
      %cst_56 = arith.constant dense<0.000000e+00> : vector<64x128xf32>
      %98 = tpu.matmul %97, %93, %cst_56 {dimension_numbers = #tpu.dot_dimension_numbers<[1], [0], [0], [1], [0, 0, 1, 1], [], []>} : vector<64x128xbf16>, vector<128x128xbf16>, vector<64x128xf32> -> vector<64x128xf32>
      %99 = vector.broadcast %94 : vector<1x128xf32> to vector<64x128xf32>
      %100 = arith.addf %98, %99 : vector<64x128xf32>
      %c0_57 = arith.constant 0 : index
      %c0_58 = arith.constant 0 : index
      %101 = vector.load %arg13[%c0_57, %c0_58] : memref<64x128xf32, #tpu.memory_space<vmem>>, vector<64x128xf32>
      tpu.vector_store %arg13[%c0_57, %c0_58], %100 {strides = array<i32>} : memref<64x128xf32, #tpu.memory_space<vmem>>, vector<64x128xf32>,
    } else {
    }
    %c0 = arith.constant 0 : index
    %c0_1 = arith.constant 0 : index
    %c0_2 = arith.constant 0 : index
    %3 = vector.load %arg5[%c0, %c0_1, %c0_2] : memref<1x128x128xf32, #tpu.memory_space<vmem>>, vector<1x128x128xf32>
    %4 = vector.shape_cast %3 : vector<1x128x128xf32> to vector<128x128xf32>
    %5 = arith.truncf %4 : vector<128x128xf32> to vector<128x128xbf16>
    %c0_3 = arith.constant 0 : index
    %c0_4 = arith.constant 0 : index
    %c0_5 = arith.constant 0 : index
    %6 = vector.load %arg7[%c0_3, %c0_4, %c0_5] : memref<1x1x128xf32, #tpu.memory_space<vmem>>, vector<1x1x128xf32>
    %7 = vector.shape_cast %6 : vector<1x1x128xf32> to vector<1x128xf32>
    %c0_6 = arith.constant 0 : index
    %c0_7 = arith.constant 0 : index
    %8 = vector.load %arg13[%c0_6, %c0_7] : memref<64x128xf32, #tpu.memory_space<vmem>>, vector<64x128xf32>
    %9 = arith.truncf %8 : vector<64x128xf32> to vector<64x128xbf16>
    %cst = arith.constant dense<0.000000e+00> : vector<64x128xf32>
    %10 = tpu.matmul %9, %5, %cst {dimension_numbers = #tpu.dot_dimension_numbers<[1], [0], [0], [1], [0, 0, 1, 1], [], []>} : vector<64x128xbf16>, vector<128x128xbf16>, vector<64x128xf32> -> vector<64x128xf32>
    %11 = vector.broadcast %7 : vector<1x128xf32> to vector<64x128xf32>
    %12 = arith.addf %10, %11 : vector<64x128xf32>
    %c0_8 = arith.constant 0 : index
    %c0_9 = arith.constant 0 : index
    %13 = vector.load %arg13[%c0_8, %c0_9] : memref<64x128xf32, #tpu.memory_space<vmem>>, vector<64x128xf32>
    tpu.vector_store %arg13[%c0_8, %c0_9], %12 {strides = array<i32>} : memref<64x128xf32, #tpu.memory_space<vmem>>, vector<64x128xf32>,
    %c0_10 = arith.constant 0 : index
    %c0_11 = arith.constant 0 : index
    %c0_12 = arith.constant 0 : index
    %14 = vector.load %arg6[%c0_10, %c0_11, %c0_12] : memref<1x128x128xf32, #tpu.memory_space<vmem>>, vector<1x128x128xf32>
    %15 = vector.shape_cast %14 : vector<1x128x128xf32> to vector<128x128xf32>
    %cst_13 = arith.constant 0.000000e+00 : f32
    %16 = vector.broadcast %cst_13 : f32 to vector<8x128xf32>
    %c0_i32_14 = arith.constant 0 : i32
    %c8_i32 = arith.constant 8 : i32
    %17 = arith.muli %c0_i32_14, %c8_i32 : i32
    %18 = tpu.assume_multiple %17, 8 : i32
    %19 = arith.index_cast %18 : i32 to index
    %c0_15 = arith.constant 0 : index
    %20 = vector.load %arg13[%19, %c0_15] : memref<64x128xf32, #tpu.memory_space<vmem>>, vector<8x128xf32>
    %cst_16 = arith.constant dense<0.000000e+00> : vector<8x128xf32>
    %21 = tpu.matmul %16, %15, %cst_16 {dimension_numbers = #tpu.dot_dimension_numbers<[1], [0], [0], [1], [0, 0, 1, 1], [], []>} : vector<8x128xf32>, vector<128x128xf32>, vector<8x128xf32> -> vector<8x128xf32>
    %22 = arith.addf %20, %21 : vector<8x128xf32>
    %23 = math.tanh %22 : vector<8x128xf32>
    %24 = arith.index_cast %18 : i32 to index
    %c0_17 = arith.constant 0 : index
    %25 = vector.load %arg13[%24, %c0_17] : memref<64x128xf32, #tpu.memory_space<vmem>>, vector<8x128xf32>
    tpu.vector_store %arg13[%24, %c0_17], %23 {strides = array<i32>} : memref<64x128xf32, #tpu.memory_space<vmem>>, vector<8x128xf32>,
    %c1_i32 = arith.constant 1 : i32
    %c8_i32_18 = arith.constant 8 : i32
    %26 = arith.muli %c1_i32, %c8_i32_18 : i32
    %27 = tpu.assume_multiple %26, 8 : i32
    %28 = arith.index_cast %27 : i32 to index
    %c0_19 = arith.constant 0 : index
    %29 = vector.load %arg13[%28, %c0_19] : memref<64x128xf32, #tpu.memory_space<vmem>>, vector<8x128xf32>
    %cst_20 = arith.constant dense<0.000000e+00> : vector<8x128xf32>
    %30 = tpu.matmul %23, %15, %cst_20 {dimension_numbers = #tpu.dot_dimension_numbers<[1], [0], [0], [1], [0, 0, 1, 1], [], []>} : vector<8x128xf32>, vector<128x128xf32>, vector<8x128xf32> -> vector<8x128xf32>
    %31 = arith.addf %29, %30 : vector<8x128xf32>
    %32 = math.tanh %31 : vector<8x128xf32>
    %33 = arith.index_cast %27 : i32 to index
    %c0_21 = arith.constant 0 : index
    %34 = vector.load %arg13[%33, %c0_21] : memref<64x128xf32, #tpu.memory_space<vmem>>, vector<8x128xf32>
    tpu.vector_store %arg13[%33, %c0_21], %32 {strides = array<i32>} : memref<64x128xf32, #tpu.memory_space<vmem>>, vector<8x128xf32>,
    %c2_i32 = arith.constant 2 : i32
    %c8_i32_22 = arith.constant 8 : i32
    %35 = arith.muli %c2_i32, %c8_i32_22 : i32
    %36 = tpu.assume_multiple %35, 8 : i32
    %37 = arith.index_cast %36 : i32 to index
    %c0_23 = arith.constant 0 : index
    %38 = vector.load %arg13[%37, %c0_23] : memref<64x128xf32, #tpu.memory_space<vmem>>, vector<8x128xf32>
    %cst_24 = arith.constant dense<0.000000e+00> : vector<8x128xf32>
    %39 = tpu.matmul %32, %15, %cst_24 {dimension_numbers = #tpu.dot_dimension_numbers<[1], [0], [0], [1], [0, 0, 1, 1], [], []>} : vector<8x128xf32>, vector<128x128xf32>, vector<8x128xf32> -> vector<8x128xf32>
    %40 = arith.addf %38, %39 : vector<8x128xf32>
    %41 = math.tanh %40 : vector<8x128xf32>
    %42 = arith.index_cast %36 : i32 to index
    %c0_25 = arith.constant 0 : index
    %43 = vector.load %arg13[%42, %c0_25] : memref<64x128xf32, #tpu.memory_space<vmem>>, vector<8x128xf32>
    tpu.vector_store %arg13[%42, %c0_25], %41 {strides = array<i32>} : memref<64x128xf32, #tpu.memory_space<vmem>>, vector<8x128xf32>,
    %c3_i32 = arith.constant 3 : i32
    %c8_i32_26 = arith.constant 8 : i32
    %44 = arith.muli %c3_i32, %c8_i32_26 : i32
    %45 = tpu.assume_multiple %44, 8 : i32
    %46 = arith.index_cast %45 : i32 to index
    %c0_27 = arith.constant 0 : index
    %47 = vector.load %arg13[%46, %c0_27] : memref<64x128xf32, #tpu.memory_space<vmem>>, vector<8x128xf32>
    %cst_28 = arith.constant dense<0.000000e+00> : vector<8x128xf32>
    %48 = tpu.matmul %41, %15, %cst_28 {dimension_numbers = #tpu.dot_dimension_numbers<[1], [0], [0], [1], [0, 0, 1, 1], [], []>} : vector<8x128xf32>, vector<128x128xf32>, vector<8x128xf32> -> vector<8x128xf32>
    %49 = arith.addf %47, %48 : vector<8x128xf32>
    %50 = math.tanh %49 : vector<8x128xf32>
    %51 = arith.index_cast %45 : i32 to index
    %c0_29 = arith.constant 0 : index
    %52 = vector.load %arg13[%51, %c0_29] : memref<64x128xf32, #tpu.memory_space<vmem>>, vector<8x128xf32>
    tpu.vector_store %arg13[%51, %c0_29], %50 {strides = array<i32>} : memref<64x128xf32, #tpu.memory_space<vmem>>, vector<8x128xf32>,
    %c4_i32 = arith.constant 4 : i32
    %c8_i32_30 = arith.constant 8 : i32
    %53 = arith.muli %c4_i32, %c8_i32_30 : i32
    %54 = tpu.assume_multiple %53, 8 : i32
    %55 = arith.index_cast %54 : i32 to index
    %c0_31 = arith.constant 0 : index
    %56 = vector.load %arg13[%55, %c0_31] : memref<64x128xf32, #tpu.memory_space<vmem>>, vector<8x128xf32>
    %cst_32 = arith.constant dense<0.000000e+00> : vector<8x128xf32>
    %57 = tpu.matmul %50, %15, %cst_32 {dimension_numbers = #tpu.dot_dimension_numbers<[1], [0], [0], [1], [0, 0, 1, 1], [], []>} : vector<8x128xf32>, vector<128x128xf32>, vector<8x128xf32> -> vector<8x128xf32>
    %58 = arith.addf %56, %57 : vector<8x128xf32>
    %59 = math.tanh %58 : vector<8x128xf32>
    %60 = arith.index_cast %54 : i32 to index
    %c0_33 = arith.constant 0 : index
    %61 = vector.load %arg13[%60, %c0_33] : memref<64x128xf32, #tpu.memory_space<vmem>>, vector<8x128xf32>
    tpu.vector_store %arg13[%60, %c0_33], %59 {strides = array<i32>} : memref<64x128xf32, #tpu.memory_space<vmem>>, vector<8x128xf32>,
    %c5_i32 = arith.constant 5 : i32
    %c8_i32_34 = arith.constant 8 : i32
    %62 = arith.muli %c5_i32, %c8_i32_34 : i32
    %63 = tpu.assume_multiple %62, 8 : i32
    %64 = arith.index_cast %63 : i32 to index
    %c0_35 = arith.constant 0 : index
    %65 = vector.load %arg13[%64, %c0_35] : memref<64x128xf32, #tpu.memory_space<vmem>>, vector<8x128xf32>
    %cst_36 = arith.constant dense<0.000000e+00> : vector<8x128xf32>
    %66 = tpu.matmul %59, %15, %cst_36 {dimension_numbers = #tpu.dot_dimension_numbers<[1], [0], [0], [1], [0, 0, 1, 1], [], []>} : vector<8x128xf32>, vector<128x128xf32>, vector<8x128xf32> -> vector<8x128xf32>
    %67 = arith.addf %65, %66 : vector<8x128xf32>
    %68 = math.tanh %67 : vector<8x128xf32>
    %69 = arith.index_cast %63 : i32 to index
    %c0_37 = arith.constant 0 : index
    %70 = vector.load %arg13[%69, %c0_37] : memref<64x128xf32, #tpu.memory_space<vmem>>, vector<8x128xf32>
    tpu.vector_store %arg13[%69, %c0_37], %68 {strides = array<i32>} : memref<64x128xf32, #tpu.memory_space<vmem>>, vector<8x128xf32>,
    %c6_i32 = arith.constant 6 : i32
    %c8_i32_38 = arith.constant 8 : i32
    %71 = arith.muli %c6_i32, %c8_i32_38 : i32
    %72 = tpu.assume_multiple %71, 8 : i32
    %73 = arith.index_cast %72 : i32 to index
    %c0_39 = arith.constant 0 : index
    %74 = vector.load %arg13[%73, %c0_39] : memref<64x128xf32, #tpu.memory_space<vmem>>, vector<8x128xf32>
    %cst_40 = arith.constant dense<0.000000e+00> : vector<8x128xf32>
    %75 = tpu.matmul %68, %15, %cst_40 {dimension_numbers = #tpu.dot_dimension_numbers<[1], [0], [0], [1], [0, 0, 1, 1], [], []>} : vector<8x128xf32>, vector<128x128xf32>, vector<8x128xf32> -> vector<8x128xf32>
    %76 = arith.addf %74, %75 : vector<8x128xf32>
    %77 = math.tanh %76 : vector<8x128xf32>
    %78 = arith.index_cast %72 : i32 to index
    %c0_41 = arith.constant 0 : index
    %79 = vector.load %arg13[%78, %c0_41] : memref<64x128xf32, #tpu.memory_space<vmem>>, vector<8x128xf32>
    tpu.vector_store %arg13[%78, %c0_41], %77 {strides = array<i32>} : memref<64x128xf32, #tpu.memory_space<vmem>>, vector<8x128xf32>,
    %c7_i32 = arith.constant 7 : i32
    %c8_i32_42 = arith.constant 8 : i32
    %80 = arith.muli %c7_i32, %c8_i32_42 : i32
    %81 = tpu.assume_multiple %80, 8 : i32
    %82 = arith.index_cast %81 : i32 to index
    %c0_43 = arith.constant 0 : index
    %83 = vector.load %arg13[%82, %c0_43] : memref<64x128xf32, #tpu.memory_space<vmem>>, vector<8x128xf32>
    %cst_44 = arith.constant dense<0.000000e+00> : vector<8x128xf32>
    %84 = tpu.matmul %77, %15, %cst_44 {dimension_numbers = #tpu.dot_dimension_numbers<[1], [0], [0], [1], [0, 0, 1, 1], [], []>} : vector<8x128xf32>, vector<128x128xf32>, vector<8x128xf32> -> vector<8x128xf32>
    %85 = arith.addf %83, %84 : vector<8x128xf32>
    %86 = math.tanh %85 : vector<8x128xf32>
    %87 = arith.index_cast %81 : i32 to index
    %c0_45 = arith.constant 0 : index
    %88 = vector.load %arg13[%87, %c0_45] : memref<64x128xf32, #tpu.memory_space<vmem>>, vector<8x128xf32>
    tpu.vector_store %arg13[%87, %c0_45], %86 {strides = array<i32>} : memref<64x128xf32, #tpu.memory_space<vmem>>, vector<8x128xf32>,
    %c8_i32_46 = arith.constant 8 : i32
    %c1_i32_47 = arith.constant 1 : i32
    %89 = arith.cmpi eq, %arg1, %c1_i32_47 : i32
    %90 = arith.extui %89 : i1 to i32
    %c0_i32_48 = arith.constant 0 : i32
    %91 = arith.cmpi ne, %90, %c0_i32_48 : i32
    scf.if %91 {
      %92 = arith.truncf %86 : vector<8x128xf32> to vector<8x128xbf16>
      %c0_49 = arith.constant 0 : index
      %c0_50 = arith.constant 0 : index
      %93 = vector.load %arg8[%c0_49, %c0_50] : memref<128x128xf32, #tpu.memory_space<vmem>>, vector<128x128xf32>
      %94 = arith.truncf %93 : vector<128x128xf32> to vector<128x128xbf16>
      %cst_51 = arith.constant dense<0.000000e+00> : vector<8x128xf32>
      %95 = tpu.matmul %92, %94, %cst_51 {dimension_numbers = #tpu.dot_dimension_numbers<[1], [0], [0], [1], [0, 0, 1, 1], [], []>} : vector<8x128xbf16>, vector<128x128xbf16>, vector<8x128xf32> -> vector<8x128xf32>
      %c0_52 = arith.constant 0 : index
      %c0_53 = arith.constant 0 : index
      %96 = vector.load %arg9[%c0_52, %c0_53] : memref<1x128xf32, #tpu.memory_space<vmem>>, vector<1x128xf32>
      %97 = vector.broadcast %96 : vector<1x128xf32> to vector<8x128xf32>
      %98 = arith.addf %95, %97 : vector<8x128xf32>
      %cst_54 = arith.constant 0.000000e+00 : f32
      %99 = vector.broadcast %cst_54 : f32 to vector<8x128xf32>
      %100 = arith.maximumf %98, %99 : vector<8x128xf32>
      %101 = arith.truncf %100 : vector<8x128xf32> to vector<8x128xbf16>
      %c0_55 = arith.constant 0 : index
      %c0_56 = arith.constant 0 : index
      %102 = vector.load %arg10[%c0_55, %c0_56] : memref<128x128xf32, #tpu.memory_space<vmem>>, vector<128x128xf32>
      %103 = arith.truncf %102 : vector<128x128xf32> to vector<128x128xbf16>
      %cst_57 = arith.constant dense<0.000000e+00> : vector<8x128xf32>
      %104 = tpu.matmul %101, %103, %cst_57 {dimension_numbers = #tpu.dot_dimension_numbers<[1], [0], [0], [1], [0, 0, 1, 1], [], []>} : vector<8x128xbf16>, vector<128x128xbf16>, vector<8x128xf32> -> vector<8x128xf32>
      %c0_58 = arith.constant 0 : index
      %c0_59 = arith.constant 0 : index
      %105 = vector.load %arg11[%c0_58, %c0_59] : memref<1x128xf32, #tpu.memory_space<vmem>>, vector<1x128xf32>
      %106 = vector.broadcast %105 : vector<1x128xf32> to vector<8x128xf32>
      %107 = arith.addf %104, %106 : vector<8x128xf32>
      %c0_60 = arith.constant 0 : index
      %c0_61 = arith.constant 0 : index
      %108 = vector.load %arg12[%c0_60, %c0_61] : memref<8x128xf32, #tpu.memory_space<vmem>>, vector<8x128xf32>
      tpu.vector_store %arg12[%c0_60, %c0_61], %107 {strides = array<i32>} : memref<8x128xf32, #tpu.memory_space<vmem>>, vector<8x128xf32>,
    } else {
    }
    return
  }
  func.func @transform_0(%arg0: i32, %arg1: i32) -> (i32, i32, i32) {
    %c0_i32 = arith.constant 0 : i32
    %c0_i32_0 = arith.constant 0 : i32
    %c0_i32_1 = arith.constant 0 : i32
    return %c0_i32, %arg0, %c0_i32_0 : i32, i32, i32
  }
  func.func @transform_1(%arg0: i32, %arg1: i32) -> (i32, i32) {
    %c0_i32 = arith.constant 0 : i32
    %c0_i32_0 = arith.constant 0 : i32
    %c0_i32_1 = arith.constant 0 : i32
    return %c0_i32, %c0_i32_0 : i32, i32
  }
  func.func @transform_2(%arg0: i32, %arg1: i32) -> (i32, i32) {
    %c0_i32 = arith.constant 0 : i32
    %c0_i32_0 = arith.constant 0 : i32
    %c0_i32_1 = arith.constant 0 : i32
    return %c0_i32, %c0_i32_0 : i32, i32
  }
  func.func @transform_3(%arg0: i32, %arg1: i32) -> (i32, i32, i32) {
    %c0_i32 = arith.constant 0 : i32
    %c0_i32_0 = arith.constant 0 : i32
    %c0_i32_1 = arith.constant 0 : i32
    return %arg1, %c0_i32, %c0_i32_0 : i32, i32, i32
  }
  func.func @transform_4(%arg0: i32, %arg1: i32) -> (i32, i32, i32) {
    %c0_i32 = arith.constant 0 : i32
    %c0_i32_0 = arith.constant 0 : i32
    %c0_i32_1 = arith.constant 0 : i32
    return %arg1, %c0_i32, %c0_i32_0 : i32, i32, i32
  }
  func.func @transform_5(%arg0: i32, %arg1: i32) -> (i32, i32, i32) {
    %c0_i32 = arith.constant 0 : i32
    %c0_i32_0 = arith.constant 0 : i32
    %c0_i32_1 = arith.constant 0 : i32
    return %arg1, %c0_i32, %c0_i32_0 : i32, i32, i32
  }
  func.func @transform_6(%arg0: i32, %arg1: i32) -> (i32, i32) {
    %c0_i32 = arith.constant 0 : i32
    %c0_i32_0 = arith.constant 0 : i32
    %c0_i32_1 = arith.constant 0 : i32
    return %c0_i32, %c0_i32_0 : i32, i32
  }
  func.func @transform_7(%arg0: i32, %arg1: i32) -> (i32, i32) {
    %c0_i32 = arith.constant 0 : i32
    %c0_i32_0 = arith.constant 0 : i32
    %c0_i32_1 = arith.constant 0 : i32
    return %c0_i32, %c0_i32_0 : i32, i32
  }
  func.func @transform_8(%arg0: i32, %arg1: i32) -> (i32, i32) {
    %c0_i32 = arith.constant 0 : i32
    %c0_i32_0 = arith.constant 0 : i32
    %c0_i32_1 = arith.constant 0 : i32
    return %c0_i32, %c0_i32_0 : i32, i32
  }
  func.func @transform_9(%arg0: i32, %arg1: i32) -> (i32, i32) {
    %c0_i32 = arith.constant 0 : i32
    %c0_i32_0 = arith.constant 0 : i32
    %c0_i32_1 = arith.constant 0 : i32
    return %c0_i32, %c0_i32_0 : i32, i32
  }
  func.func @transform_10(%arg0: i32, %arg1: i32) -> (i32, i32) {
    %c0_i32 = arith.constant 0 : i32
    %c0_i32_0 = arith.constant 0 : i32
    return %arg0, %c0_i32 : i32, i32
  }
}

</mosaic_0001>

<bundles_post_ra>
// kernel: rnn_forward.1
= control target key start
LH: loop header
LB: loop body
LE: loop exit
PB: predicated region body
PF: predicated region fallthrough
CT: control target
= control target key end

     0   :  { %s2421_s13 = smov 0   ;;  %s2423_s14 = smov 0   ;;  %s2897_s0 = inlined_call_operand.vmem [shape: f32[8,8,128], index: 0, kind: input, shape index: {}]   ;;  %s2898_s1 = inlined_call_operand.vmem [shape: f32[128,128], index: 1, kind: input, shape index: {}]   ;;  %s2899_s2 = inlined_call_operand.vmem [shape: f32[1,128], index: 2, kind: input, shape index: {}]   ;;  %s2900_s3 = inlined_call_operand.vmem [shape: f32[2,128,128], index: 3, kind: input, shape index: {}]   ;;  %s2901_s4 = inlined_call_operand.vmem [shape: f32[2,128,128], index: 4, kind: input, shape index: {}]   ;;  %s2902_s5 = inlined_call_operand.vmem [shape: f32[2,1,128], index: 5, kind: input, shape index: {}]   ;;  %s2903_s6 = inlined_call_operand.vmem [shape: f32[128,128], index: 6, kind: input, shape index: {}]   ;;  %s2904_s7 = inlined_call_operand.vmem [shape: f32[1,128], index: 7, kind: input, shape index: {}]   ;;  %s2905_s8 = inlined_call_operand.vmem [shape: f32[128,128], index: 8, kind: input, shape index: {}]   ;;  %s2906_s9 = inlined_call_operand.vmem [shape: f32[1,128], index: 9, kind: input, shape index: {}]   ;;  %s2907_s10 = inlined_call_operand.vmem [shape: f32[8,128], index: 10, kind: output, shape index: {}]  }
   0x1   :  { %s2425_s15 = smov 0  }
   0x2 LB: > { %s29_s16 = sadd.s32 1, %s2355_s14  ;;  %p1522_p0 = scmp.ge.s32.totalorder %s2359_s15, 1  ;;  %s2359_s15 = sphi %s2425_s15, %s20_s15   ;;  %s2355_s14 = sphi %s2423_s14, %s2909_s14   ;;  %s2351_s13 = sphi %s2421_s13, %s2908_s13  }
   0x3   : > { %p30_p1 = scmp.ge.s32.totalorder %s29_s16, 2  ;;  %p351_p2 = scmp.lt.s32.totalorder %s2359_s15, 3 }
   0x5   : > { %s2911_s16 = smov (%p30_p1, %s29_s16), 0  ;;  %p352_p3 = pnand %p1522_p0, %p351_p2 }
   0x6   : > { %p404_p4 = scmp.lt.s32.totalorder (!%p352_p3), %s2351_s13, 1  ;;  %p1527_p5 = scmp.ne.s32.totalorder (!%p352_p3), %s2351_s13, 0 }
   0x7   : > { %355 = sbr.rel (%p352_p3) target bundleno = 2541 (0x9ed), region = 60 }
   0xe   : > { %s2443_s17 = scalar_select %p404_p4, %s2351_s13, 1 }
   0xf   : > { %425 = sbr.rel (%p1527_p5) target bundleno = 268 (0x10c), region = 64  ;;  %v426_v0 = vld [vmem:[%s2898_s1] sm:$0xff] (!%p1527_p5)  ;;  %v427_v1 = vld [vmem:[%s2898_s1 + $0x8] sm:$0xff] (!%p1527_p5)  ;;  %v428_v2 = vld [vmem:[%s2898_s1 + $0x10] sm:$0xff] (!%p1527_p5) }
  0x10   : > { %s1536_s18 = sshll.u32 %s2443_s17, 7  ;;  %s416_s21 = scalar_lea.vmem %s2902_s5, %s2443_s17  ;;  %v442_v3 = vpack.c.bf16 (!%p1527_p5), %v427_v1, %v426_v0  ;;  %v429_v4 = vld [vmem:[%s2898_s1 + $0x18] sm:$0xff] (!%p1527_p5)  ;;  %v430_v6 = vld [vmem:[%s2898_s1 + $0x20] sm:$0xff] (!%p1527_p5)  ;;  %v431_v7 = vld [vmem:[%s2898_s1 + $0x28] sm:$0xff] (!%p1527_p5) }
  0x11   : > { %s2453_s24 = scalar_lea.vmem %s2900_s3, %s1536_s18  ;;  %s2458_s27 = scalar_lea.vmem %s2901_s4, %s1536_s18  ;;  %v443_v5 = vpack.c.bf16 (!%p1527_p5), %v429_v4, %v428_v2  ;;  %v444_v8 = vpack.c.bf16 (!%p1527_p5), %v431_v7, %v430_v6  ;;  %v432_v9 = vld [vmem:[%s2898_s1 + $0x30] sm:$0xff] (!%p1527_p5)  ;;  %v451_v10 = vld [vmem:[%s2897_s0] sm:$0xff] (!%p1527_p5)  ;;  %v452_v11 = vld [vmem:[%s2897_s0 + $0x8] sm:$0xff] (!%p1527_p5) }
  0x12   : > { %1716 = vmatprep.subr.bf16.mxu0 (!%p1527_p5), %v442_v3  ;;  %2276 = vmatprep.subr.bf16.mxu1 (!%p1527_p5), %v442_v3  ;;  %v433_v12 = vld [vmem:[%s2898_s1 + $0x38] sm:$0xff] (!%p1527_p5)  ;;  %v459_v13 = vpack.c.bf16 (!%p1527_p5), %v452_v11, %v451_v10  ;;  %v455_v14 = vld [vmem:[%s2897_s0 + $0x20] sm:$0xff] (!%p1527_p5)  ;;  %v456_v15 = vld [vmem:[%s2897_s0 + $0x28] sm:$0xff] (!%p1527_p5) }
  0x13   : > { %1717 = vmatpush3.bf16.msra.mxu0 (!%p1527_p5), %v442_v3  ;;  %2284 = vmatpush3.bf16.msra.mxu1 (!%p1527_p5), %v442_v3  ;;  %v461_v16 = vpack.c.bf16 (!%p1527_p5), %v456_v15, %v455_v14  ;;  %v445_v17 = vpack.c.bf16 (!%p1527_p5), %v433_v12, %v432_v9  ;;  %v434_v18 = vld [vmem:[%s2898_s1 + $0x40] sm:$0xff] (!%p1527_p5)  ;;  %v435_v19 = vld [vmem:[%s2898_s1 + $0x48] sm:$0xff] (!%p1527_p5)  ;;  %v436_v21 = vld [vmem:[%s2898_s1 + $0x50] sm:$0xff] (!%p1527_p5) }
  0x14   : > { %1718 = vmatprep.subr.bf16.mxu0 (!%p1527_p5), %v443_v5  ;;  %2277 = vmatprep.subr.bf16.mxu1 (!%p1527_p5), %v443_v5  ;;  %v446_v20 = vpack.c.bf16 (!%p1527_p5), %v435_v19, %v434_v18  ;;  %v437_v22 = vld [vmem:[%s2898_s1 + $0x58] sm:$0xff] (!%p1527_p5)  ;;  %v438_v24 = vld [vmem:[%s2898_s1 + $0x60] sm:$0xff] (!%p1527_p5)  ;;  %v439_v25 = vld [vmem:[%s2898_s1 + $0x68] sm:$0xff] (!%p1527_p5) }
  0x15   : > { %1732 = vmatprep.mubr.bf16.mxu0 (!%p1527_p5), %v459_v13  ;;  %1736 = vmatprep.mubr.bf16.mxu1 (!%p1527_p5), %v461_v16  ;;  %v447_v23 = vpack.c.bf16 (!%p1527_p5), %v437_v22, %v436_v21  ;;  %v448_v26 = vpack.c.bf16 (!%p1527_p5), %v439_v25, %v438_v24  ;;  %v440_v27 = vld [vmem:[%s2898_s1 + $0x70] sm:$0xff] (!%p1527_p5)  ;;  %v441_v28 = vld [vmem:[%s2898_s1 + $0x78] sm:$0xff] (!%p1527_p5)  ;;  %v1528_v36 = vld [vmem:[%s2899_s2] ss:$0 sm:$0xff] (!%p1527_p5) }
  0x16   : > { %v449_v29 = vpack.c.bf16 %v441_v28, %v440_v27  ;;  %v453_v30 = vld [vmem:[%s2897_s0 + $0x10] sm:$0xff]  ;;  %v454_v31 = vld [vmem:[%s2897_s0 + $0x18] sm:$0xff] }
  0x17   : > { %1719 = vmatpush3.bf16.msra.mxu0 %v443_v5  ;;  %2285 = vmatpush3.bf16.msra.mxu1 %v443_v5  ;;  %v457_v32 = vld [vmem:[%s2897_s0 + $0x30] sm:$0xff]  ;;  %v458_v33 = vld [vmem:[%s2897_s0 + $0x38] sm:$0xff]  ;;  %v460_v34 = vpack.c.bf16 %v454_v31, %v453_v30 }
  0x18   : > { %1720 = vmatprep.subr.bf16.mxu0 %v444_v8  ;;  %2278 = vmatprep.subr.bf16.mxu1 %v444_v8  ;;  %v462_v35 = vpack.c.bf16 %v458_v33, %v457_v32 }
  0x1b   : > { %1721 = vmatpush3.bf16.msra.mxu0 %v444_v8  ;;  %2286 = vmatpush3.bf16.msra.mxu1 %v444_v8 }
  0x1c   : > { %1722 = vmatprep.subr.bf16.mxu0 %v445_v17  ;;  %2279 = vmatprep.subr.bf16.mxu1 %v445_v17 }
  0x1f   : > { %1723 = vmatpush3.bf16.msra.mxu0 %v445_v17  ;;  %2287 = vmatpush3.bf16.msra.mxu1 %v445_v17 }
  0x20   : > { %1724 = vmatprep.subr.bf16.mxu0 %v446_v20  ;;  %2280 = vmatprep.subr.bf16.mxu1 %v446_v20 }
  0x23   : > { %1725 = vmatpush3.bf16.msra.mxu0 %v446_v20  ;;  %2288 = vmatpush3.bf16.msra.mxu1 %v446_v20 }
  0x24   : > { %1726 = vmatprep.subr.bf16.mxu0 %v447_v23  ;;  %2281 = vmatprep.subr.bf16.mxu1 %v447_v23 }
  0x27   : > { %1727 = vmatpush3.bf16.msra.mxu0 %v447_v23  ;;  %2289 = vmatpush3.bf16.msra.mxu1 %v447_v23 }
  0x28   : > { %1728 = vmatprep.subr.bf16.mxu0 %v448_v26  ;;  %2282 = vmatprep.subr.bf16.mxu1 %v448_v26 }
  0x2b   : > { %1729 = vmatpush3.bf16.msra.mxu0 %v448_v26  ;;  %2290 = vmatpush3.bf16.msra.mxu1 %v448_v26 }
  0x2c   : > { %1730 = vmatprep.subr.bf16.mxu0 %v449_v29  ;;  %2283 = vmatprep.subr.bf16.mxu1 %v449_v29 }
  0x2f   : > { %1731 = vmatpush3.bf16.msra.mxu0 %v449_v29  ;;  %2291 = vmatpush3.bf16.msra.mxu1 %v449_v29 }
  0x32   : > { %1733 = vmatmul.mubr.bf16.vlgmr.msra.gmra.mrb[0].mxu0 %v460_v34  ;;  %1737 = vmatmul.mubr.bf16.vlgmr.msra.gmra.mrb[0].mxu1 %v462_v35 }
 0x105   : > { %v1734_v37 = vpop.f32.mrb[0].mxu0  ;;  %v1738_v38 = vpop.f32.mrb[0].mxu1 }
 0x106   : > { %v512_v39 = vadd.f32 %v1734_v37, %v1528_v36  ;;  %v528_v40 = vadd.f32 %v1738_v38, %v1528_v36  ;;  %v503_v41 = vpop.f32.mrb[1].mxu0  ;;  %v519_v42 = vpop.f32.mrb[1].mxu1 }
 0x107   : > { %v504_v43 = vadd.f32 %v1528_v36, %v503_v41  ;;  %v520_v44 = vadd.f32 %v1528_v36, %v519_v42  ;;  %v1735_v45 = vpop.f32.mrb[2].mxu0  ;;  %v1739_v46 = vpop.f32.mrb[2].mxu1 }
 0x108   : > { %536 = vst [vmem:[#allocation2 + $0x10] sm:$0xff] %v512_v39  ;;  %540 = vst [vmem:[#allocation2 + $0x30] sm:$0xff] %v528_v40  ;;  %v515_v47 = vadd.f32 %v1735_v45, %v1528_v36  ;;  %v531_v48 = vadd.f32 %v1739_v46, %v1528_v36  ;;  %v506_v49 = vpop.f32.mrb[3].mxu0  ;;  %v522_v50 = vpop.f32.mrb[3].mxu1 }
 0x109   : > { %534 = vst [vmem:[#allocation2] sm:$0xff] %v504_v43  ;;  %538 = vst [vmem:[#allocation2 + $0x20] sm:$0xff] %v520_v44  ;;  %v507_v51 = vadd.f32 %v1528_v36, %v506_v49  ;;  %v523_v52 = vadd.f32 %v1528_v36, %v522_v50 }
 0x10a   : > { %537 = vst [vmem:[#allocation2 + $0x18] sm:$0xff] %v515_v47  ;;  %541 = vst [vmem:[#allocation2 + $0x38] sm:$0xff] %v531_v48 }
 0x10b   : > { %535 = vst [vmem:[#allocation2 + $0x8] sm:$0xff] %v507_v51  ;;  %539 = vst [vmem:[#allocation2 + $0x28] sm:$0xff] %v523_v52 }
 0x10c PF: > { %v542_v53 = vld [vmem:[%s2453_s24] sm:$0xff]  ;;  %v543_v54 = vld [vmem:[%s2453_s24 + $0x8] sm:$0xff]  ;;  %v544_v55 = vld [vmem:[%s2453_s24 + $0x10] sm:$0xff]  ;;  %v2361_v59 = vmov 0.0|0.0   ;;  %vm2362_vm0 = vmmov 0   ;;  %v2363_v60 = vmov 0.0  }
 0x10d   : > { %v558_v56 = vpack.c.bf16 %v543_v54, %v542_v53  ;;  %v545_v57 = vld [vmem:[%s2453_s24 + $0x18] sm:$0xff]  ;;  %v546_v58 = vld [vmem:[%s2453_s24 + $0x20] sm:$0xff]  ;;  %2084 = vmatprep.subr.bf16.mxu1 %v2361_v59  ;;  %1796 = vmatprep.mubr.msk.f32.mxu1 %vm2362_vm0, %v2363_v60  ;;  %v547_v62 = vld [vmem:[%s2453_s24 + $0x28] sm:$0xff]  ;;  %p1530_p6 = scmp.ne.s32.totalorder %s2351_s13, 1 }
 0x10e   : > { %v559_v61 = vpack.c.bf16 %v545_v57, %v544_v55  ;;  %v658_v63 = vld [vmem:[%s2458_s27] sm:$0xff]  ;;  %v659_v0 = vld [vmem:[%s2458_s27 + $0x8] sm:$0xff]  ;;  %v660_v2 = vld [vmem:[%s2458_s27 + $0x10] sm:$0xff]  ;;  %v560_v4 = vpack.c.bf16 %v547_v62, %v546_v58  ;;  %vm2365_vm1 = vmmov (!%p1530_p6), 0  }
 0x10f   : > { %1740 = vmatprep.subr.bf16.mxu0 %v558_v56  ;;  %v2547_v1 = vpack.c.bf16 %v659_v0, %v658_v63  ;;  %v661_v3 = vld [vmem:[%s2458_s27 + $0x18] sm:$0xff]  ;;  %v548_v5 = vld [vmem:[%s2453_s24 + $0x30] sm:$0xff]  ;;  %v662_v8 = vld [vmem:[%s2458_s27 + $0x20] sm:$0xff] }
 0x110   : > { %1741 = vmatpush3.bf16.msra.mxu0 %v558_v56  ;;  %v2553_v6 = vpack.c.bf16 %v661_v3, %v660_v2  ;;  %v549_v7 = vld [vmem:[%s2453_s24 + $0x38] sm:$0xff]  ;;  %v663_v9 = vld [vmem:[%s2458_s27 + $0x28] sm:$0xff]  ;;  %v567_v10 = vld [vmem:[#allocation2] sm:$0xff] }
 0x111   : > { %1742 = vmatprep.subr.bf16.mxu0 %v559_v61  ;;  %2086 = vmatpush3.bf16.msra.mxu1 %v2547_v1  ;;  %v561_v11 = vpack.c.bf16 %v549_v7, %v548_v5  ;;  %v550_v12 = vld [vmem:[%s2453_s24 + $0x40] sm:$0xff]  ;;  %v2561_v13 = vpack.c.bf16 %v663_v9, %v662_v8  ;;  %v551_v15 = vld [vmem:[%s2453_s24 + $0x48] sm:$0xff]  ;;  %v664_v16 = vld [vmem:[%s2458_s27 + $0x30] sm:$0xff] }
 0x112   : > { %2087 = vmatprep.subr.bf16.mxu1 %v2361_v59  ;;  %v568_v14 = vld [vmem:[#allocation2 + $0x8] sm:$0xff]  ;;  %v665_v17 = vld [vmem:[%s2458_s27 + $0x38] sm:$0xff]  ;;  %v562_v19 = vpack.c.bf16 %v551_v15, %v550_v12  ;;  %v552_v20 = vld [vmem:[%s2453_s24 + $0x50] sm:$0xff] }
 0x113   : > { %v575_v18 = vpack.c.bf16 %v568_v14, %v567_v10  ;;  %v2569_v21 = vpack.c.bf16 %v665_v17, %v664_v16  ;;  %v553_v22 = vld [vmem:[%s2453_s24 + $0x58] sm:$0xff]  ;;  %v666_v23 = vld [vmem:[%s2458_s27 + $0x40] sm:$0xff]  ;;  %v667_v24 = vld [vmem:[%s2458_s27 + $0x48] sm:$0xff] }
 0x114   : > { %1743 = vmatpush3.bf16.msra.mxu0 %v559_v61  ;;  %v563_v25 = vpack.c.bf16 %v553_v22, %v552_v20  ;;  %v554_v26 = vld [vmem:[%s2453_s24 + $0x60] sm:$0xff]  ;;  %v2577_v27 = vpack.c.bf16 %v667_v24, %v666_v23  ;;  %v555_v28 = vld [vmem:[%s2453_s24 + $0x68] sm:$0xff]  ;;  %v668_v29 = vld [vmem:[%s2458_s27 + $0x50] sm:$0xff] }
 0x115   : > { %1744 = vmatprep.subr.bf16.mxu0 %v560_v4  ;;  %2089 = vmatpush3.bf16.msra.mxu1 %v2553_v6  ;;  %v669_v30 = vld [vmem:[%s2458_s27 + $0x58] sm:$0xff]  ;;  %v564_v31 = vpack.c.bf16 %v555_v28, %v554_v26  ;;  %v556_v32 = vld [vmem:[%s2453_s24 + $0x70] sm:$0xff]  ;;  %v670_v35 = vld [vmem:[%s2458_s27 + $0x60] sm:$0xff] }
 0x116   : > { %2090 = vmatprep.subr.bf16.mxu1 %v2361_v59  ;;  %1756 = vmatprep.mubr.bf16.mxu0 %v575_v18  ;;  %v2585_v33 = vpack.c.bf16 %v669_v30, %v668_v29  ;;  %v557_v34 = vld [vmem:[%s2453_s24 + $0x78] sm:$0xff]  ;;  %v671_v36 = vld [vmem:[%s2458_s27 + $0x68] sm:$0xff]  ;;  %v672_v39 = vld [vmem:[%s2458_s27 + $0x70] sm:$0xff] }
 0x117   : > { %v565_v37 = vpack.c.bf16 %v557_v34, %v556_v32  ;;  %v2592_v38 = vpack.c.bf16 %v671_v36, %v670_v35  ;;  %v673_v40 = vld [vmem:[%s2458_s27 + $0x78] sm:$0xff]  ;;  %v569_v41 = vld [vmem:[#allocation2 + $0x10] sm:$0xff]  ;;  %v571_v45 = vld [vmem:[#allocation2 + $0x20] sm:$0xff] }
 0x118   : > { %1745 = vmatpush3.bf16.msra.mxu0 %v560_v4  ;;  %v570_v42 = vld [vmem:[#allocation2 + $0x18] sm:$0xff]  ;;  %v2598_v43 = vpack.c.bf16 %v673_v40, %v672_v39  ;;  %v572_v46 = vld [vmem:[#allocation2 + $0x28] sm:$0xff]  ;;  %v573_v48 = vld [vmem:[#allocation2 + $0x30] sm:$0xff]  ;;  %v2364_v39 = vmov (!%p1530_p6), 0.0  }
 0x119   : > { %1746 = vmatprep.subr.bf16.mxu0 %v561_v11  ;;  %2092 = vmatpush3.bf16.msra.mxu1 %v2561_v13  ;;  %v576_v44 = vpack.c.bf16 %v570_v42, %v569_v41  ;;  %v577_v47 = vpack.c.bf16 %v572_v46, %v571_v45  ;;  %v574_v49 = vld [vmem:[#allocation2 + $0x38] sm:$0xff]  ;;  %v2646_v51 = vld [vmem:[%s416_s21] ss:$0 sm:$0xff]  ;;  %v1352_v46 = vld [vmem:[%s2905_s8 + $0x8] sm:$0xff] (!%p1530_p6) }
 0x11a   : > { %2093 = vmatprep.subr.bf16.mxu1 %v2361_v59  ;;  %v578_v50 = vpack.c.bf16 %v574_v49, %v573_v48  ;;  %v1278_v36 = vld [vmem:[%s2903_s6] sm:$0xff] (!%p1530_p6)  ;;  %v1281_v41 = vld [vmem:[%s2903_s6 + $0x18] sm:$0xff] (!%p1530_p6)  ;;  %v1353_v48 = vld [vmem:[%s2905_s8 + $0x10] sm:$0xff] (!%p1530_p6) }
 0x11b   : > { %v1351_v45 = vld [vmem:[%s2905_s8] sm:$0xff] (!%p1530_p6)  ;;  %v1354_v49 = vld [vmem:[%s2905_s8 + $0x18] sm:$0xff] (!%p1530_p6) }
 0x11c   : > { %1747 = vmatpush3.bf16.msra.mxu0 %v561_v11 }
 0x11d   : > { %1748 = vmatprep.subr.bf16.mxu0 %v562_v19  ;;  %2095 = vmatpush3.bf16.msra.mxu1 %v2569_v21 }
 0x11e   : > { %2096 = vmatprep.subr.bf16.mxu1 %v2361_v59 }
 0x120   : > { %1749 = vmatpush3.bf16.msra.mxu0 %v562_v19 }
 0x121   : > { %1750 = vmatprep.subr.bf16.mxu0 %v563_v25  ;;  %2098 = vmatpush3.bf16.msra.mxu1 %v2577_v27 }
 0x122   : > { %2099 = vmatprep.subr.bf16.mxu1 %v2361_v59 }
 0x124   : > { %1751 = vmatpush3.bf16.msra.mxu0 %v563_v25 }
 0x125   : > { %1752 = vmatprep.subr.bf16.mxu0 %v564_v31  ;;  %2101 = vmatpush3.bf16.msra.mxu1 %v2585_v33 }
 0x126   : > { %2102 = vmatprep.subr.bf16.mxu1 %v2361_v59 }
 0x128   : > { %1753 = vmatpush3.bf16.msra.mxu0 %v564_v31 }
 0x129   : > { %1754 = vmatprep.subr.bf16.mxu0 %v565_v37  ;;  %2104 = vmatpush3.bf16.msra.mxu1 %v2592_v38 }
 0x12a   : > { %2105 = vmatprep.subr.bf16.mxu1 %v2361_v59 }
 0x12c   : > { %1755 = vmatpush3.bf16.msra.mxu0 %v565_v37  ;;  %v1279_v37 = vld [vmem:[%s2903_s6 + $0x8] sm:$0xff] (!%p1530_p6) }
 0x12d   : > { %2107 = vmatpush3.bf16.msra.mxu1 %v2598_v43  ;;  %2108 = vmatprep.subr.bf16.mxu0 %v2361_v59  ;;  %v1294_v40 = vpack.c.bf16 (!%p1530_p6), %v1279_v37, %v1278_v36 }
 0x12e   : > { %2132 = vmatprep.subr.bf16.mxu1 %v2361_v59 }
 0x12f   : > { %1757 = vmatmul.mubr.bf16.vlgmr.msra.gmra.mrb[0].mxu0 %v576_v44  ;;  %v1283_v44 = vld [vmem:[%s2903_s6 + $0x28] sm:$0xff] (!%p1530_p6) }
 0x130   : > { %1797 = vmatmul.mubr.f32.vlgmr.msra.gmra.mrb[0].mxu1 %v2363_v60  ;;  %2110 = vmatpush3.bf16.msra.mxu0 %v2547_v1 }
 0x131   : > { %2111 = vmatprep.subr.bf16.mxu0 %v2361_v59  ;;  %2134 = vmatpush3.bf16.msra.mxu1 %v2547_v1 }
 0x132   : > { %2135 = vmatprep.subr.bf16.mxu1 %v2361_v59  ;;  %1866 = vmatprep.mubr.msk.f32.mxu1 %vm2362_vm0, %v2363_v60 }
 0x133   : > { %1760 = vmatprep.mubr.bf16.mxu0 %v577_v47  ;;  %v1367_v47 = vpack.c.bf16 (!%p1530_p6), %v1352_v46, %v1351_v45 }
 0x134   : > { %2113 = vmatpush3.bf16.msra.mxu0 %v2553_v6 }
 0x135   : > { %2114 = vmatprep.subr.bf16.mxu0 %v2361_v59  ;;  %2137 = vmatpush3.bf16.msra.mxu1 %v2553_v6 }
 0x136   : > { %2138 = vmatprep.subr.bf16.mxu1 %v2361_v59 }
 0x137   : > { %1761 = vmatmul.mubr.bf16.gmra.mrb[4].mxu0 %v578_v50 }
 0x138   : > { %2116 = vmatpush3.bf16.msra.mxu0 %v2561_v13  ;;  %1831 = vmatprep.mubr.msk.f32.mxu0 %vm2362_vm0, %v2363_v60 }
 0x139   : > { %2117 = vmatprep.subr.bf16.mxu0 %v2361_v59  ;;  %2140 = vmatpush3.bf16.msra.mxu1 %v2561_v13 }
 0x13a   : > { %2141 = vmatprep.subr.bf16.mxu1 %v2361_v59 }
 0x13c   : > { %2119 = vmatpush3.bf16.msra.mxu0 %v2569_v21 }
 0x13d   : > { %2120 = vmatprep.subr.bf16.mxu0 %v2361_v59  ;;  %2143 = vmatpush3.bf16.msra.mxu1 %v2569_v21 }
 0x13e   : > { %2144 = vmatprep.subr.bf16.mxu1 %v2361_v59 }
 0x140   : > { %2122 = vmatpush3.bf16.msra.mxu0 %v2577_v27 }
 0x141   : > { %2123 = vmatprep.subr.bf16.mxu0 %v2361_v59  ;;  %2146 = vmatpush3.bf16.msra.mxu1 %v2577_v27 }
 0x142   : > { %2147 = vmatprep.subr.bf16.mxu1 %v2361_v59 }
 0x144   : > { %2125 = vmatpush3.bf16.msra.mxu0 %v2585_v33 }
 0x145   : > { %2126 = vmatprep.subr.bf16.mxu0 %v2361_v59  ;;  %2149 = vmatpush3.bf16.msra.mxu1 %v2585_v33 }
 0x146   : > { %2150 = vmatprep.subr.bf16.mxu1 %v2361_v59 }
 0x148   : > { %2128 = vmatpush3.bf16.msra.mxu0 %v2592_v38 }
 0x149   : > { %2129 = vmatprep.subr.bf16.mxu0 %v2361_v59  ;;  %2152 = vmatpush3.bf16.msra.mxu1 %v2592_v38 }
 0x14a   : > { %2153 = vmatprep.subr.bf16.mxu1 %v2361_v59 }
 0x14c   : > { %2131 = vmatpush3.bf16.msra.mxu0 %v2598_v43 }
 0x14d   : > { %2155 = vmatpush3.bf16.msra.mxu1 %v2598_v43  ;;  %2156 = vmatprep.subr.bf16.mxu0 %v2361_v59 }
 0x14e   : > { %2180 = vmatprep.subr.bf16.mxu1 %v2361_v59 }
 0x202   : > { %v1758_v52 = vpop.f32.mrb[0].mxu0 }
 0x203   : > { %v619_v53 = vpop.f32.mrb[1].mxu0  ;;  %v741_v54 = vpop.f32.mrb[0].mxu1  ;;  %v628_v10 = vadd.f32 %v1758_v52, %v2646_v51  ;;  %v1285_v52 = vld [vmem:[%s2903_s6 + $0x38] sm:$0xff] (!%p1530_p6) }
 0x204   : > { %v620_v55 = vadd.f32 %v2646_v51, %v619_v53  ;;  %v2649_v56 = vpop.f32.mrb[2].mxu0  ;;  %v1798_v57 = vpop.f32.mrb[1].mxu1  ;;  %v1368_v53 = vpack.c.bf16 (!%p1530_p6), %v1354_v49, %v1353_v48 }
 0x205   : > { %v622_v58 = vpop.f32.mrb[3].mxu0  ;;  %v631_v16 = vadd.f32 %v2649_v56, %v2646_v51  ;;  %v1286_v57 = vld [vmem:[%s2903_s6 + $0x40] sm:$0xff] (!%p1530_p6) }
 0x206   : > { %v745_v61 = vadd.f32 %v741_v54, %v620_v55  ;;  %v623_v4 = vadd.f32 %v2646_v51, %v622_v58  ;;  %v1355_v54 = vld [vmem:[%s2905_s8 + $0x20] sm:$0xff] (!%p1530_p6)  ;;  %v1356_v55 = vld [vmem:[%s2905_s8 + $0x28] sm:$0xff] (!%p1530_p6) }
 0x207   : > { %v1287_v58 = vld [vmem:[%s2903_s6 + $0x48] sm:$0xff] (!%p1530_p6) }
 0x208   : > { %2321 = vtanh.f32 %v745_v61  ;;  %v1369_v61 = vpack.c.bf16 (!%p1530_p6), %v1356_v55, %v1355_v54 }
 0x20a   : > { %v2669_v63 = vpop.f32.mrb[4].mxu0 }
 0x20b   : > { %v2671_v0 = vpop.f32.mrb[5].mxu0 }
 0x20c   : > { %v2673_v2 = vpop.f32.mrb[6].mxu0  ;;  %v636_v22 = vadd.f32 %v2646_v51, %v2671_v0  ;;  %v1298_v0 = vpack.c.bf16 (!%p1530_p6), %v1287_v58, %v1286_v57 }
 0x20d   : > { %v2675_v3 = vpop.f32.mrb[7].mxu0  ;;  %v647_v31 = vadd.f32 %v2673_v2, %v2646_v51  ;;  %v1288_v2 = vld [vmem:[%s2903_s6 + $0x50] sm:$0xff] (!%p1530_p6) }
 0x212   : > { %v2322_v62 = vpop.eup %2321 }
 0x213   : > { %747 = vst [vmem:[#allocation2] sm:$0xff] %v2322_v62  ;;  %1832 = vmatmul.mubr.f32.vlgmr.msra.gmra.mrb[8].mxu0 %v2322_v62  ;;  %v1357_v62 = vld [vmem:[%s2905_s8 + $0x30] sm:$0xff] (!%p1530_p6) }
 0x214   : > { %2158 = vmatpush3.bf16.msra.mxu0 %v2547_v1  ;;  %1901 = vmatprep.mubr.msk.f32.mxu0 %vm2362_vm0, %v2363_v60 }
 0x215   : > { %2159 = vmatprep.subr.bf16.mxu0 %v2361_v59 }
 0x218   : > { %2161 = vmatpush3.bf16.msra.mxu0 %v2553_v6 }
 0x219   : > { %2162 = vmatprep.subr.bf16.mxu0 %v2361_v59 }
 0x21c   : > { %2164 = vmatpush3.bf16.msra.mxu0 %v2561_v13 }
 0x21d   : > { %2165 = vmatprep.subr.bf16.mxu0 %v2361_v59 }
 0x220   : > { %2167 = vmatpush3.bf16.msra.mxu0 %v2569_v21 }
 0x221   : > { %2168 = vmatprep.subr.bf16.mxu0 %v2361_v59 }
 0x224   : > { %2170 = vmatpush3.bf16.msra.mxu0 %v2577_v27 }
 0x225   : > { %2171 = vmatprep.subr.bf16.mxu0 %v2361_v59 }
 0x228   : > { %2173 = vmatpush3.bf16.msra.mxu0 %v2585_v33 }
 0x229   : > { %2174 = vmatprep.subr.bf16.mxu0 %v2361_v59 }
 0x22c   : > { %2176 = vmatpush3.bf16.msra.mxu0 %v2592_v38 }
 0x22d   : > { %2177 = vmatprep.subr.bf16.mxu0 %v2361_v59 }
 0x230   : > { %2179 = vmatpush3.bf16.msra.mxu0 %v2598_v43 }
 0x231   : > { %2204 = vmatprep.subr.bf16.mxu0 %v2361_v59 }
 0x2e6   : > { %v816_v5 = vpop.f32.mrb[8].mxu0 }
 0x2e7   : > { %v820_v7 = vadd.f32 %v816_v5, %v623_v4  ;;  %v1833_v8 = vpop.f32.mrb[9].mxu0  ;;  %v1359_v5 = vld [vmem:[%s2905_s8 + $0x40] sm:$0xff] (!%p1530_p6) }
 0x2e9   : > { %2323 = vtanh.f32 %v820_v7  ;;  %v1360_v7 = vld [vmem:[%s2905_s8 + $0x48] sm:$0xff] (!%p1530_p6) }
 0x2f3   : > { %v2324_v9 = vpop.eup %2323 }
 0x2f4   : > { %822 = vst [vmem:[#allocation2 + $0x8] sm:$0xff] %v2324_v9  ;;  %1867 = vmatmul.mubr.f32.vlgmr.msra.gmra.mrb[2].mxu1 %v2324_v9  ;;  %v1290_v9 = vld [vmem:[%s2903_s6 + $0x60] sm:$0xff] (!%p1530_p6) }
 0x2f5   : > { %2182 = vmatpush3.bf16.msra.mxu1 %v2547_v1  ;;  %1936 = vmatprep.mubr.msk.f32.mxu1 %vm2362_vm0, %v2363_v60 }
 0x2f6   : > { %2183 = vmatprep.subr.bf16.mxu1 %v2361_v59 }
 0x2f9   : > { %2185 = vmatpush3.bf16.msra.mxu1 %v2553_v6 }
 0x2fa   : > { %2186 = vmatprep.subr.bf16.mxu1 %v2361_v59 }
 0x2fd   : > { %2188 = vmatpush3.bf16.msra.mxu1 %v2561_v13 }
 0x2fe   : > { %2189 = vmatprep.subr.bf16.mxu1 %v2361_v59 }
 0x301   : > { %2191 = vmatpush3.bf16.msra.mxu1 %v2569_v21 }
 0x302   : > { %2192 = vmatprep.subr.bf16.mxu1 %v2361_v59 }
 0x305   : > { %2194 = vmatpush3.bf16.msra.mxu1 %v2577_v27 }
 0x306   : > { %2195 = vmatprep.subr.bf16.mxu1 %v2361_v59 }
 0x309   : > { %2197 = vmatpush3.bf16.msra.mxu1 %v2585_v33 }
 0x30a   : > { %2198 = vmatprep.subr.bf16.mxu1 %v2361_v59 }
 0x30d   : > { %2200 = vmatpush3.bf16.msra.mxu1 %v2592_v38 }
 0x30e   : > { %2201 = vmatprep.subr.bf16.mxu1 %v2361_v59 }
 0x311   : > { %2203 = vmatpush3.bf16.msra.mxu1 %v2598_v43 }
 0x312   : > { %2228 = vmatprep.subr.bf16.mxu1 %v2361_v59 }
 0x3c7   : > { %v891_v11 = vpop.f32.mrb[2].mxu1 }
 0x3c8   : > { %v895_v12 = vadd.f32 %v891_v11, %v628_v10  ;;  %v1868_v14 = vpop.f32.mrb[3].mxu1  ;;  %v1291_v10 = vld [vmem:[%s2903_s6 + $0x68] sm:$0xff] (!%p1530_p6)  ;;  %v1371_v11 = vpack.c.bf16 (!%p1530_p6), %v1360_v7, %v1359_v5 }
 0x3c9   : > { %v1362_v14 = vld [vmem:[%s2905_s8 + $0x58] sm:$0xff] (!%p1530_p6) }
 0x3ca   : > { %2325 = vtanh.f32 %v895_v12  ;;  %v1361_v12 = vld [vmem:[%s2905_s8 + $0x50] sm:$0xff] (!%p1530_p6) }
 0x3d4   : > { %v2326_v15 = vpop.eup %2325 }
 0x3d5   : > { %897 = vst [vmem:[#allocation2 + $0x10] sm:$0xff] %v2326_v15  ;;  %1902 = vmatmul.mubr.f32.vlgmr.msra.gmra.mrb[10].mxu0 %v2326_v15  ;;  %v1300_v15 = vpack.c.bf16 (!%p1530_p6), %v1291_v10, %v1290_v9 }
 0x3d6   : > { %2206 = vmatpush3.bf16.msra.mxu0 %v2547_v1  ;;  %1971 = vmatprep.mubr.msk.f32.mxu0 %vm2362_vm0, %v2363_v60 }
 0x3d7   : > { %2207 = vmatprep.subr.bf16.mxu0 %v2361_v59 }
 0x3da   : > { %2209 = vmatpush3.bf16.msra.mxu0 %v2553_v6 }
 0x3db   : > { %2210 = vmatprep.subr.bf16.mxu0 %v2361_v59 }
 0x3de   : > { %2212 = vmatpush3.bf16.msra.mxu0 %v2561_v13 }
 0x3df   : > { %2213 = vmatprep.subr.bf16.mxu0 %v2361_v59 }
 0x3e2   : > { %2215 = vmatpush3.bf16.msra.mxu0 %v2569_v21 }
 0x3e3   : > { %2216 = vmatprep.subr.bf16.mxu0 %v2361_v59 }
 0x3e6   : > { %2218 = vmatpush3.bf16.msra.mxu0 %v2577_v27 }
 0x3e7   : > { %2219 = vmatprep.subr.bf16.mxu0 %v2361_v59 }
 0x3ea   : > { %2221 = vmatpush3.bf16.msra.mxu0 %v2585_v33 }
 0x3eb   : > { %2222 = vmatprep.subr.bf16.mxu0 %v2361_v59 }
 0x3ee   : > { %2224 = vmatpush3.bf16.msra.mxu0 %v2592_v38 }
 0x3ef   : > { %2225 = vmatprep.subr.bf16.mxu0 %v2361_v59 }
 0x3f2   : > { %2227 = vmatpush3.bf16.msra.mxu0 %v2598_v43 }
 0x3f3   : > { %2252 = vmatprep.subr.bf16.mxu0 %v2361_v59 }
 0x4a8   : > { %v966_v17 = vpop.f32.mrb[10].mxu0 }
 0x4a9   : > { %v970_v18 = vadd.f32 %v966_v17, %v631_v16  ;;  %v1903_v19 = vpop.f32.mrb[11].mxu0  ;;  %v1292_v16 = vld [vmem:[%s2903_s6 + $0x70] sm:$0xff] (!%p1530_p6)  ;;  %v1293_v17 = vld [vmem:[%s2903_s6 + $0x78] sm:$0xff] (!%p1530_p6) }
 0x4aa   : > { %v1301_v19 = vpack.c.bf16 (!%p1530_p6), %v1293_v17, %v1292_v16 }
 0x4ab   : > { %2327 = vtanh.f32 %v970_v18  ;;  %v1372_v18 = vpack.c.bf16 (!%p1530_p6), %v1362_v14, %v1361_v12 }
 0x4b5   : > { %v2328_v20 = vpop.eup %2327 }
 0x4b6   : > { %972 = vst [vmem:[#allocation2 + $0x18] sm:$0xff] %v2328_v20  ;;  %1937 = vmatmul.mubr.f32.vlgmr.msra.gmra.mrb[4].mxu1 %v2328_v20 }
 0x4b7   : > { %2230 = vmatpush3.bf16.msra.mxu1 %v2547_v1  ;;  %2006 = vmatprep.mubr.msk.f32.mxu1 %vm2362_vm0, %v2363_v60 }
 0x4b8   : > { %2231 = vmatprep.subr.bf16.mxu1 %v2361_v59 }
 0x4bb   : > { %2233 = vmatpush3.bf16.msra.mxu1 %v2553_v6 }
 0x4bc   : > { %2234 = vmatprep.subr.bf16.mxu1 %v2361_v59 }
 0x4bf   : > { %2236 = vmatpush3.bf16.msra.mxu1 %v2561_v13 }
 0x4c0   : > { %2237 = vmatprep.subr.bf16.mxu1 %v2361_v59 }
 0x4c3   : > { %2239 = vmatpush3.bf16.msra.mxu1 %v2569_v21 }
 0x4c4   : > { %2240 = vmatprep.subr.bf16.mxu1 %v2361_v59 }
 0x4c7   : > { %2242 = vmatpush3.bf16.msra.mxu1 %v2577_v27 }
 0x4c8   : > { %2243 = vmatprep.subr.bf16.mxu1 %v2361_v59 }
 0x4cb   : > { %2245 = vmatpush3.bf16.msra.mxu1 %v2585_v33 }
 0x4cc   : > { %2246 = vmatprep.subr.bf16.mxu1 %v2361_v59 }
 0x4cf   : > { %2248 = vmatpush3.bf16.msra.mxu1 %v2592_v38 }
 0x4d0   : > { %2249 = vmatprep.subr.bf16.mxu1 %v2361_v59 }
 0x4d3   : > { %2251 = vmatpush3.bf16.msra.mxu1 %v2598_v43 }
 0x4d4   : > { %2064 = vmatprep.subr.bf16.mxu1 (!%p1530_p6), %v2364_v39 }
 0x589   : > { %v1041_v23 = vpop.f32.mrb[4].mxu1 }
 0x58a   : > { %v1045_v24 = vadd.f32 %v1041_v23, %v636_v22  ;;  %v1938_v25 = vpop.f32.mrb[5].mxu1  ;;  %v1363_v22 = vld [vmem:[%s2905_s8 + $0x60] sm:$0xff] (!%p1530_p6)  ;;  %v1364_v23 = vld [vmem:[%s2905_s8 + $0x68] sm:$0xff] (!%p1530_p6) }
 0x58b   : > { %v1365_v25 = vld [vmem:[%s2905_s8 + $0x70] sm:$0xff] (!%p1530_p6) }
 0x58c   : > { %2329 = vtanh.f32 %v1045_v24  ;;  %v1373_v24 = vpack.c.bf16 (!%p1530_p6), %v1364_v23, %v1363_v22 }
 0x596   : > { %v2330_v26 = vpop.eup %2329 }
 0x597   : > { %1047 = vst [vmem:[#allocation2 + $0x20] sm:$0xff] %v2330_v26  ;;  %1972 = vmatmul.mubr.f32.vlgmr.msra.gmra.mrb[12].mxu0 %v2330_v26  ;;  %v1366_v26 = vld [vmem:[%s2905_s8 + $0x78] sm:$0xff] (!%p1530_p6) }
 0x598   : > { %2254 = vmatpush3.bf16.msra.mxu0 %v2547_v1  ;;  %2041 = vmatprep.mubr.msk.f32.mxu0 %vm2362_vm0, %v2363_v60  ;;  %v639_v60 = vadd.f32 %v2646_v51, %v2675_v3  ;;  %v1289_v3 = vld [vmem:[%s2903_s6 + $0x58] sm:$0xff] (!%p1530_p6) }
 0x599   : > { %2255 = vmatprep.subr.bf16.mxu0 %v2361_v59  ;;  %v1299_v8 = vpack.c.bf16 (!%p1530_p6), %v1289_v3, %v1288_v2 }
 0x59c   : > { %2257 = vmatpush3.bf16.msra.mxu0 %v2553_v6 }
 0x59d   : > { %2258 = vmatprep.subr.bf16.mxu0 %v2361_v59 }
 0x5a0   : > { %2260 = vmatpush3.bf16.msra.mxu0 %v2561_v13 }
 0x5a1   : > { %2261 = vmatprep.subr.bf16.mxu0 %v2361_v59 }
 0x5a4   : > { %2263 = vmatpush3.bf16.msra.mxu0 %v2569_v21 }
 0x5a5   : > { %2264 = vmatprep.subr.bf16.mxu0 %v2361_v59 }
 0x5a8   : > { %2266 = vmatpush3.bf16.msra.mxu0 %v2577_v27  ;;  %v644_v27 = vadd.f32 %v2669_v63, %v2646_v51  ;;  %v1284_v51 = vld [vmem:[%s2903_s6 + $0x30] sm:$0xff] (!%p1530_p6)  ;;  %v1358_v63 = vld [vmem:[%s2905_s8 + $0x38] sm:$0xff] (!%p1530_p6) }
 0x5a9   : > { %2267 = vmatprep.subr.bf16.mxu0 %v2361_v59  ;;  %v1297_v56 = vpack.c.bf16 (!%p1530_p6), %v1285_v52, %v1284_v51  ;;  %v1370_v4 = vpack.c.bf16 (!%p1530_p6), %v1358_v63, %v1357_v62 }
 0x5ac   : > { %2269 = vmatpush3.bf16.msra.mxu0 %v2585_v33 }
 0x5ad   : > { %2270 = vmatprep.subr.bf16.mxu0 %v2361_v59 }
 0x5b0   : > { %2272 = vmatpush3.bf16.msra.mxu0 %v2592_v38  ;;  %v1280_v38 = vld [vmem:[%s2903_s6 + $0x10] sm:$0xff] (!%p1530_p6) }
 0x5b1   : > { %2273 = vmatprep.subr.bf16.mxu0 %v2361_v59  ;;  %v1295_v42 = vpack.c.bf16 (!%p1530_p6), %v1281_v41, %v1280_v38 }
 0x5b4   : > { %2275 = vmatpush3.bf16.msra.mxu0 %v2598_v43  ;;  %v1282_v43 = vld [vmem:[%s2903_s6 + $0x20] sm:$0xff] (!%p1530_p6) }
 0x5b5   : > { %2044 = vmatprep.subr.bf16.mxu0 (!%p1530_p6), %v2364_v39  ;;  %v1296_v50 = vpack.c.bf16 (!%p1530_p6), %v1283_v44, %v1282_v43 }
 0x66a   : > { %v1116_v1 = vpop.f32.mrb[12].mxu0 }
 0x66b   : > { %v1120_v6 = vadd.f32 %v1116_v1, %v639_v60  ;;  %v1973_v13 = vpop.f32.mrb[13].mxu0  ;;  %v1374_v60 = vpack.c.bf16 (!%p1530_p6), %v1366_v26, %v1365_v25  ;;  %v1531_v1 = vld [vmem:[%s2904_s7] ss:$0 sm:$0xff] (!%p1530_p6) }
 0x66d   : > { %2331 = vtanh.f32 %v1120_v6 }
 0x677   : > { %v2332_v21 = vpop.eup %2331 }
 0x678   : > { %1122 = vst [vmem:[#allocation2 + $0x28] sm:$0xff] %v2332_v21  ;;  %2007 = vmatmul.mubr.f32.vlgmr.msra.gmra.mrb[6].mxu1 %v2332_v21 }
 0x679   : > { %2080 = vmatprep.mubr.msk.bf16.mxu1 (!%p1530_p6), %vm2365_vm1, %v2364_v39  ;;  %2065 = vmatpush3.bf16.msra.mxu1 (!%p1530_p6), %v1367_v47 }
 0x67a   : > { %2066 = vmatprep.subr.bf16.mxu1 (!%p1530_p6), %v2364_v39 }
 0x67d   : > { %2067 = vmatpush3.bf16.msra.mxu1 (!%p1530_p6), %v1368_v53 }
 0x67e   : > { %2068 = vmatprep.subr.bf16.mxu1 (!%p1530_p6), %v2364_v39 }
 0x681   : > { %2069 = vmatpush3.bf16.msra.mxu1 (!%p1530_p6), %v1369_v61 }
 0x682   : > { %2070 = vmatprep.subr.bf16.mxu1 (!%p1530_p6), %v2364_v39 }
 0x685   : > { %2071 = vmatpush3.bf16.msra.mxu1 (!%p1530_p6), %v1370_v4 }
 0x686   : > { %2072 = vmatprep.subr.bf16.mxu1 (!%p1530_p6), %v2364_v39 }
 0x689   : > { %2073 = vmatpush3.bf16.msra.mxu1 (!%p1530_p6), %v1371_v11 }
 0x68a   : > { %2074 = vmatprep.subr.bf16.mxu1 (!%p1530_p6), %v2364_v39 }
 0x68d   : > { %2075 = vmatpush3.bf16.msra.mxu1 (!%p1530_p6), %v1372_v18 }
 0x68e   : > { %2076 = vmatprep.subr.bf16.mxu1 (!%p1530_p6), %v2364_v39 }
 0x691   : > { %2077 = vmatpush3.bf16.msra.mxu1 (!%p1530_p6), %v1373_v24 }
 0x692   : > { %2078 = vmatprep.subr.bf16.mxu1 (!%p1530_p6), %v2364_v39 }
 0x695   : > { %2079 = vmatpush3.bf16.msra.mxu1 (!%p1530_p6), %v1374_v60 }
 0x74b   : > { %v1191_v28 = vpop.f32.mrb[6].mxu1 }
 0x74c   : > { %v1195_v29 = vadd.f32 %v1191_v28, %v644_v27  ;;  %v2008_v30 = vpop.f32.mrb[7].mxu1 }
 0x74e   : > { %2333 = vtanh.f32 %v1195_v29 }
 0x758   : > { %v2334_v59 = vpop.eup %2333 }
 0x759   : > { %1197 = vst [vmem:[#allocation2 + $0x30] sm:$0xff] %v2334_v59  ;;  %2042 = vmatmul.mubr.f32.vlgmr.msra.gmra.mrb[14].mxu0 %v2334_v59  ;;  %v1532_v59 = vld [vmem:[%s2906_s9] ss:$0 sm:$0xff] (!%p1530_p6) }
 0x75a   : > { %2060 = vmatprep.mubr.msk.bf16.mxu0 (!%p1530_p6), %vm2365_vm1, %v2364_v39  ;;  %2045 = vmatpush3.bf16.msra.mxu0 (!%p1530_p6), %v1294_v40 }
 0x75b   : > { %2046 = vmatprep.subr.bf16.mxu0 (!%p1530_p6), %v2364_v39 }
 0x75e   : > { %2047 = vmatpush3.bf16.msra.mxu0 (!%p1530_p6), %v1295_v42 }
 0x75f   : > { %2048 = vmatprep.subr.bf16.mxu0 (!%p1530_p6), %v2364_v39 }
 0x762   : > { %2049 = vmatpush3.bf16.msra.mxu0 (!%p1530_p6), %v1296_v50 }
 0x763   : > { %2050 = vmatprep.subr.bf16.mxu0 (!%p1530_p6), %v2364_v39 }
 0x766   : > { %2051 = vmatpush3.bf16.msra.mxu0 (!%p1530_p6), %v1297_v56 }
 0x767   : > { %2052 = vmatprep.subr.bf16.mxu0 (!%p1530_p6), %v2364_v39 }
 0x76a   : > { %2053 = vmatpush3.bf16.msra.mxu0 (!%p1530_p6), %v1298_v0 }
 0x76b   : > { %2054 = vmatprep.subr.bf16.mxu0 (!%p1530_p6), %v2364_v39 }
 0x76e   : > { %2055 = vmatpush3.bf16.msra.mxu0 (!%p1530_p6), %v1299_v8 }
 0x76f   : > { %2056 = vmatprep.subr.bf16.mxu0 (!%p1530_p6), %v2364_v39 }
 0x772   : > { %2057 = vmatpush3.bf16.msra.mxu0 (!%p1530_p6), %v1300_v15 }
 0x773   : > { %2058 = vmatprep.subr.bf16.mxu0 (!%p1530_p6), %v2364_v39 }
 0x776   : > { %2059 = vmatpush3.bf16.msra.mxu0 (!%p1530_p6), %v1301_v19 }
 0x82c   : > { %v1266_v32 = vpop.f32.mrb[14].mxu0 }
 0x82d   : > { %v1270_v33 = vadd.f32 %v1266_v32, %v647_v31  ;;  %v2043_v34 = vpop.f32.mrb[15].mxu0 }
 0x82f   : > { %2335 = vtanh.f32 %v1270_v33 }
 0x834   : > { %1276 = sbr.rel (%p1530_p6) target bundleno = 2541 (0x9ed), region = 68 }
 0x839   : > { %v2759_v35 = vpop.eup %2335 }
 0x83a   : > { %1272 = vst [vmem:[#allocation2 + $0x38] sm:$0xff] %v2759_v35  ;;  %v1277_v20 = vpack.c.bf16 (!%p1530_p6), %v2759_v35, %v2759_v35 }
 0x83c   : > { %2061 = vmatmul.mubr.bf16.vlgmr.msra.gmra.mrb[0].mxu0 %v1277_v20 }
 0x90f   : > { %v1343_v6 = vpop.f32.mrb[0].mxu0 }
 0x910   : > { %v1344_v13 = vadd.f32 %v1531_v1, %v1343_v6  ;;  %v2062_v21 = vpop.f32.mrb[1].mxu0 }
 0x911   : > { %v1346_v27 = vpop.f32.mrb[2].mxu0 }
 0x912   : > { %v1349_v28 = vmax.f32 %v1344_v13, 0.0  ;;  %v2063_v29 = vpop.f32.mrb[3].mxu0 }
 0x914   : > { %v1350_v30 = vpack.c.bf16 %v1349_v28, %v1349_v28 }
 0x916   : > { %2081 = vmatmul.mubr.bf16.vlgmr.msra.gmra.mrb[0].mxu1 %v1350_v30 }
 0x9e9   : > { %v1416_v31 = vpop.f32.mrb[0].mxu1 }
 0x9ea   : > { %v1417_v32 = vadd.f32 %v1532_v59, %v1416_v31  ;;  %v2082_v33 = vpop.f32.mrb[1].mxu1 }
 0x9eb   : > { %v1419_v34 = vpop.f32.mrb[2].mxu1 }
 0x9ec   : > { %1422 = vst [vmem:[%s2907_s10] sm:$0xff] %v1417_v32  ;;  %v2083_v35 = vpop.f32.mrb[3].mxu1 }
 0x9ed PF: > { %s20_s15 = sadd.s32 1, %s2359_s15   ;;  %s2908_s13 = smov %s2355_s14 }
 0x9ee   : > { %p17_p7 = scmp.ge.s32.totalorder %s20_s15, 4   ;;  %s2909_s14 = smov %s2911_s16 }
 0x9f0   :  { %19 = sbr.rel (!%p17_p7) target bundleno = 2 (0x2), region = 114 }

</bundles_post_ra>
